<compile_context>
chip_gen: v6e
topology: v6e:2x2x1
jax: 0.10.0
libtpu: 0.0.40
codegen_flags: <defaults>
</compile_context>

<pallas_src>
import jax
import jax.numpy as jnp
from jax.experimental import pallas as pl
from jax.experimental.pallas import tpu as pltpu


def _round_up(x, m):
    return ((x + m - 1) // m) * m


def _make_kernel(e2p, hp, mx):
    """Build the forward kernel with the static block sizes baked in.

    e2p : padded 2*encode_dim   (rows of the fused-encoder output)
    hp  : padded hidden_dim     (rows of h1/h2)
    mx  : e2p + hp              (rows of the stacked x-consuming weight block)
    """

    def kernel(x_ref, w_ref, m_ref, out_ref):
        # x_ref  : (TB, DFP)        batch-major activation tile (op dtype)
        # w_ref  : (mx + 2*hp, DFP) packed MXU-operand weights (op dtype):
        #            rows [0, mx)          W_X = [fused encoders ; fc1-on-state]
        #            rows [mx, mx+hp)      W1E (fc1 acting on [enc_gmm|enc_act])
        #            rows [mx+hp, mx+2hp)  W2
        # m_ref  : (max(e2p,hp), 8) f32    col0=bA col1=b1 col2=b2 col3=w3 col4[0]=b3
        # out_ref: (1, TB)          q values, batch on lanes (lane-dense store)
        f32 = jnp.float32
        cd = x_ref.dtype                              # MXU operand dtype
        nt = (((1,), (1,)), ((), ()))                 # contract last dims: A @ B.T

        x = x_ref[...]                                # (TB, DFP)
        w_x = w_ref[0:mx, :]                          # (mx, DFP)
        w1e = w_ref[mx:mx + hp, 0:e2p]                # (hp, e2p)
        w2 = w_ref[mx + hp:mx + 2 * hp, 0:hp]         # (hp, hp)

        ba = m_ref[0:e2p, 0:1]                        # (e2p, 1) broadcast over lanes
        b1 = m_ref[0:hp, 1:2]
        b2 = m_ref[0:hp, 2:3]
        w3 = m_ref[0:hp, 3:4]
        b3 = m_ref[0:1, 4:5]                          # (1, 1) scalar

        # One stacked MXU pass over x; result is feature-major:
        #   rows [0, e2p)  = encoder pre-activations for [gmm ; action]
        #   rows [e2p, mx) = fc1 contribution from the raw state features
        z = jax.lax.dot_general(w_x, x, nt, preferred_element_type=f32)  # (mx, TB)

        enc = jnp.maximum(z[0:e2p] + ba, 0.0)         # [enc_gmm ; enc_action]

        # fc1 on cat(state, enc_gmm, enc_action) == z_bottom + W1E @ enc (exact).
        h1 = jnp.maximum(
            z[e2p:mx]
            + jnp.dot(w1e, enc.astype(cd), preferred_element_type=f32)
            + b1, 0.0)

        # fc2 + ReLU
        h2 = jnp.maximum(
            jnp.dot(w2, h1.astype(cd), preferred_element_type=f32) + b2, 0.0)

        # (hidden -> 1) head: VPU multiply + sublane reduction over live rows only.
        q = jnp.sum(h2 * w3, axis=0, keepdims=True) + b3          # (1, TB) f32
        out_ref[...] = q.astype(out_ref.dtype)

    return kernel


def pack_params(params, state_dim, gmm_dim, action_dim, *, dfp, rt, op_dtype):
    """Pack weights into one MXU-operand slab (op dtype) + one f32 misc slab."""
    E = params["wg"].shape[0]
    hid = params["w2"].shape[0]
    sd, gd, ad = state_dim, gmm_dim, action_dim
    e2p = _round_up(2 * E, rt)
    hp = _round_up(hid, rt)
    mx = e2p + hp
    assert sd + gd + ad <= dfp and 2 * E <= dfp and hid <= dfp

    f32 = jnp.float32
    # Stacked x-consuming block: fused block-diagonal encoders + fc1-on-state.
    w_x = jnp.zeros((mx, dfp), f32)
    w_x = w_x.at[0:E, sd:sd + gd].set(params["wg"])                  # gmm encoder
    w_x = w_x.at[E:2 * E, sd + gd:sd + gd + ad].set(params["wa"])    # action encoder
    w1 = params["w1"]                                                # (hid, sd + 2E)
    w_x = w_x.at[e2p:e2p + hid, 0:sd].set(w1[:, :sd])                # fc1 on state

    w1e = jnp.zeros((hp, dfp), f32).at[:hid, :2 * E].set(w1[:, sd:sd + 2 * E])
    w2 = jnp.zeros((hp, dfp), f32).at[:hid, :hid].set(params["w2"])
    w_slab = jnp.concatenate([w_x, w1e, w2], axis=0).astype(op_dtype)

    # Biases / head stay f32 (they never touch the MXU).
    mr = max(e2p, hp)
    misc = jnp.zeros((mr, 8), f32)
    misc = misc.at[0:E, 0].set(params["bg"])
    misc = misc.at[E:2 * E, 0].set(params["ba"])
    misc = misc.at[:hid, 1].set(params["b1"])
    misc = misc.at[:hid, 2].set(params["b2"])
    misc = misc.at[:hid, 3].set(params["w3"][0])
    misc = misc.at[0, 4].set(params["b3"][0])
    return w_slab, misc, (e2p, hp, mx)


def soft_q_forward(state, gmm, action, params, *, tb=None, use_bf16=True):
    """params: PyTorch-convention weights (out, in) and biases (out,)."""
    B, sd = state.shape
    gd = gmm.shape[-1]
    ad = action.shape[-1]
    d_f = sd + gd + ad

    op_dtype = jnp.bfloat16 if use_bf16 else jnp.float32
    rt = 16 if use_bf16 else 8                 # sublane tile of the operand dtype
    dfp = _round_up(d_f, rt)                   # 48 (bf16) / 40 (f32) here

    if tb is None:
        # Big tiles amortize per-step pipeline overhead; cap at ceil(B/2) so
        # B >= 256 always yields >= 2 grid steps (both v7x TensorCores).
        tb = min(2048, max(128, pl.cdiv(B, 2)))
        tb = _round_up(tb, 128)
    b_pad = pl.cdiv(B, tb) * tb

    w_slab, misc, (e2p, hp, mx) = pack_params(
        params, sd, gd, ad, dfp=dfp, rt=rt, op_dtype=op_dtype)

    # Thin batch-major activation slab: concat + small feature pad + cast only.
    # No XLA-side transpose / 128-wide padding; the transpose is folded into the
    # first matmul's dimension numbers inside the kernel.
    x = jnp.concatenate([state, gmm, action], axis=-1).astype(jnp.float32)
    x = jnp.pad(x, ((0, b_pad - B), (0, dfp - d_f))).astype(op_dtype)

    kernel = _make_kernel(e2p, hp, mx)
    out = pl.pallas_call(
        kernel,
        out_shape=jax.ShapeDtypeStruct((1, b_pad), jnp.float32),
        grid_spec=pltpu.PrefetchScalarGridSpec(
            num_scalar_prefetch=0,
            grid=(b_pad // tb,),
            in_specs=[
                pl.BlockSpec((tb, dfp), lambda i: (i, 0)),      # batch-tiled activations
                pl.BlockSpec(w_slab.shape, lambda i: (0, 0)),   # resident weight slab
                pl.BlockSpec(misc.shape, lambda i: (0, 0)),     # resident f32 biases/head
            ],
            out_specs=pl.BlockSpec((1, tb), lambda i: (0, i)),  # lane-dense q row
        ),
        compiler_params=pltpu.CompilerParams(
            dimension_semantics=("parallel",)),                 # megacore on v7x
    )(x, w_slab, misc)

    return out[0, :B].reshape(B, 1)


def init_params(key, state_dim, gmm_dim, action_dim, encode_dim, hidden_dim):
    """Deterministic PyTorch-Linear-style init: U(-1/sqrt(in), 1/sqrt(in))."""
    def linear(k, out_d, in_d):
        kw, kb = jax.random.split(k)
        bound = 1.0 / jnp.sqrt(in_d)
        w = jax.random.uniform(kw, (out_d, in_d), jnp.float32, -bound, bound)
        b = jax.random.uniform(kb, (out_d,), jnp.float32, -bound, bound)
        return w, b

    ks = jax.random.split(key, 5)
    wg, bg = linear(ks[0], encode_dim, gmm_dim)
    wa, ba = linear(ks[1], encode_dim, action_dim)
    w1, b1 = linear(ks[2], hidden_dim, state_dim + 2 * encode_dim)
    w2, b2 = linear(ks[3], hidden_dim, hidden_dim)
    w3, b3 = linear(ks[4], 1, hidden_dim)
    return dict(wg=wg, bg=bg, wa=wa, ba=ba,
                w1=w1, b1=b1, w2=w2, b2=b2, w3=w3, b3=b3)


def reference_forward(state, gmm, action, p):
    """Pure-JAX reference mirroring the PyTorch module."""
    eg = jax.nn.relu(gmm @ p["wg"].T + p["bg"])
    ea = jax.nn.relu(action @ p["wa"].T + p["ba"])
    x = jnp.concatenate([state, eg], axis=-1)
    h = jnp.concatenate([x, ea], axis=-1)
    h1 = jax.nn.relu(h @ p["w1"].T + p["b1"])
    h2 = jax.nn.relu(h1 @ p["w2"].T + p["b2"])
    return h2 @ p["w3"].T + p["b3"]


if __name__ == "__main__":
    state_dim, gmm_dim, action_dim, encode_dim, hidden_dim = 10, 24, 6, 8, 32

    key = jax.random.PRNGKey(0)
    k_s, k_g, k_a, k_p = jax.random.split(key, 4)
    params = init_params(k_p, state_dim, gmm_dim, action_dim, encode_dim, hidden_dim)

    # Small-batch check (single grid step), exact f32 path.
    B = 4
    state = jax.random.normal(k_s, (B, state_dim), jnp.float32)
    gmm = jax.random.normal(k_g, (B, gmm_dim), jnp.float32)
    action = jax.random.normal(k_a, (B, action_dim), jnp.float32)
    q_ref = reference_forward(state, gmm, action, params)

    q = jax.block_until_ready(
        soft_q_forward(state, gmm, action, params, use_bf16=False))
    assert q.shape == (B, 1)
    assert jnp.allclose(q, q_ref, atol=1e-5, rtol=1e-5), (q, q_ref)

    # Multi-tile (grid > 1) check with non-multiple-of-tile batch, f32.
    B2 = 300
    k_s2, k_g2, k_a2 = jax.random.split(jax.random.PRNGKey(1), 3)
    state2 = jax.random.normal(k_s2, (B2, state_dim), jnp.float32)
    gmm2 = jax.random.normal(k_g2, (B2, gmm_dim), jnp.float32)
    action2 = jax.random.normal(k_a2, (B2, action_dim), jnp.float32)
    q2 = jax.block_until_ready(
        soft_q_forward(state2, gmm2, action2, params, tb=128, use_bf16=False))
    q2_ref = reference_forward(state2, gmm2, action2, params)
    assert q2.shape == (B2, 1)
    assert jnp.allclose(q2, q2_ref, atol=1e-5, rtol=1e-5)

    # Default path: bf16 MXU operands (f32 accumulation, f32 biases/head), auto tile.
    q3 = jax.block_until_ready(soft_q_forward(state2, gmm2, action2, params))
    assert q3.shape == (B2, 1)
    assert jnp.all(jnp.isfinite(q3))
    assert jnp.allclose(q3, q2_ref, atol=1e-1, rtol=1e-1)

    print("KERNEL_OK")
</pallas_src>

<mosaic_0001>
module attributes {stable_mosaic.version = 11 : i64} {
  func.func @kernel(%arg0: i32, %arg1: memref<128x40xf32, #tpu.memory_space<vmem>>, %arg2: memref<112x40xf32, #tpu.memory_space<vmem>>, %arg3: memref<32x8xf32, #tpu.memory_space<vmem>>, %arg4: memref<1x128xf32, #tpu.memory_space<vmem>>) attributes {dimension_semantics = [#tpu.dimension_semantics<parallel>], iteration_bounds = array<i64: 1>, scalar_prefetch = 0 : i64, scratch_operands = 0 : i64, tpu.core_type = #tpu.core_type<tc>, window_params = [{transform_indices = @transform_0, window_bounds = array<i64: 128, 40>}, {pipeline_mode = #tpu.pipeline_mode<synchronous>, transform_indices = @transform_1, window_bounds = array<i64: 112, 40>}, {pipeline_mode = #tpu.pipeline_mode<synchronous>, transform_indices = @transform_2, window_bounds = array<i64: 32, 8>}, {transform_indices = @transform_3, window_bounds = array<i64: 1, 128>}]} {
    %c0 = arith.constant 0 : index
    %c0_0 = arith.constant 0 : index
    %0 = vector.load %arg1[%c0, %c0_0] : memref<128x40xf32, #tpu.memory_space<vmem>>, vector<128x40xf32>
    %c0_1 = arith.constant 0 : index
    %c0_2 = arith.constant 0 : index
    %1 = vector.load %arg2[%c0_1, %c0_2] : memref<112x40xf32, #tpu.memory_space<vmem>>, vector<48x40xf32>
    %c48 = arith.constant 48 : index
    %c0_3 = arith.constant 0 : index
    %2 = vector.load %arg2[%c48, %c0_3] : memref<112x40xf32, #tpu.memory_space<vmem>>, vector<32x16xf32>
    %c80 = arith.constant 80 : index
    %c0_4 = arith.constant 0 : index
    %3 = vector.load %arg2[%c80, %c0_4] : memref<112x40xf32, #tpu.memory_space<vmem>>, vector<32x32xf32>
    %c0_5 = arith.constant 0 : index
    %c0_6 = arith.constant 0 : index
    %4 = vector.load %arg3[%c0_5, %c0_6] : memref<32x8xf32, #tpu.memory_space<vmem>>, vector<16x1xf32>
    %c0_7 = arith.constant 0 : index
    %c1 = arith.constant 1 : index
    %5 = vector.load %arg3[%c0_7, %c1] : memref<32x8xf32, #tpu.memory_space<vmem>>, vector<32x1xf32>
    %c0_8 = arith.constant 0 : index
    %c2 = arith.constant 2 : index
    %6 = vector.load %arg3[%c0_8, %c2] : memref<32x8xf32, #tpu.memory_space<vmem>>, vector<32x1xf32>
    %c0_9 = arith.constant 0 : index
    %c3 = arith.constant 3 : index
    %7 = vector.load %arg3[%c0_9, %c3] : memref<32x8xf32, #tpu.memory_space<vmem>>, vector<32x1xf32>
    %c0_10 = arith.constant 0 : index
    %c4 = arith.constant 4 : index
    %8 = vector.load %arg3[%c0_10, %c4] : memref<32x8xf32, #tpu.memory_space<vmem>>, vector<1x1xf32>
    %cst = arith.constant dense<0.000000e+00> : vector<48x128xf32>
    %9 = tpu.matmul %1, %0, %cst {dimension_numbers = #tpu.dot_dimension_numbers<[1], [1], [0], [0], [0, 0, 1, 0], [], []>} : vector<48x40xf32>, vector<128x40xf32>, vector<48x128xf32> -> vector<48x128xf32>
    %10 = vector.extract_strided_slice %9 {offsets = [0, 0], sizes = [16, 128], strides = [1, 1]} : vector<48x128xf32> to vector<16x128xf32>
    %11 = vector.broadcast %4 : vector<16x1xf32> to vector<16x128xf32>
    %12 = arith.addf %10, %11 : vector<16x128xf32>
    %cst_11 = arith.constant 0.000000e+00 : f32
    %13 = vector.broadcast %cst_11 : f32 to vector<16x128xf32>
    %14 = arith.maximumf %12, %13 : vector<16x128xf32>
    %15 = vector.extract_strided_slice %9 {offsets = [16, 0], sizes = [32, 128], strides = [1, 1]} : vector<48x128xf32> to vector<32x128xf32>
    %cst_12 = arith.constant dense<0.000000e+00> : vector<32x128xf32>
    %16 = tpu.matmul %2, %14, %cst_12 {dimension_numbers = #tpu.dot_dimension_numbers<[1], [0], [0], [1], [0, 0, 1, 1], [], []>} : vector<32x16xf32>, vector<16x128xf32>, vector<32x128xf32> -> vector<32x128xf32>
    %17 = arith.addf %15, %16 : vector<32x128xf32>
    %18 = vector.broadcast %5 : vector<32x1xf32> to vector<32x128xf32>
    %19 = arith.addf %17, %18 : vector<32x128xf32>
    %cst_13 = arith.constant 0.000000e+00 : f32
    %20 = vector.broadcast %cst_13 : f32 to vector<32x128xf32>
    %21 = arith.maximumf %19, %20 : vector<32x128xf32>
    %cst_14 = arith.constant dense<0.000000e+00> : vector<32x128xf32>
    %22 = tpu.matmul %3, %21, %cst_14 {dimension_numbers = #tpu.dot_dimension_numbers<[1], [0], [0], [1], [0, 0, 1, 1], [], []>} : vector<32x32xf32>, vector<32x128xf32>, vector<32x128xf32> -> vector<32x128xf32>
    %23 = vector.broadcast %6 : vector<32x1xf32> to vector<32x128xf32>
    %24 = arith.addf %22, %23 : vector<32x128xf32>
    %cst_15 = arith.constant 0.000000e+00 : f32
    %25 = vector.broadcast %cst_15 : f32 to vector<32x128xf32>
    %26 = arith.maximumf %24, %25 : vector<32x128xf32>
    %27 = vector.broadcast %7 : vector<32x1xf32> to vector<32x128xf32>
    %28 = arith.mulf %26, %27 : vector<32x128xf32>
    %cst_16 = arith.constant dense<0.000000e+00> : vector<128xf32>
    %29 = vector.multi_reduction <add>, %28, %cst_16 [0] : vector<32x128xf32> to vector<128xf32>
    %30 = vector.shape_cast %29 : vector<128xf32> to vector<1x128xf32>
    %31 = vector.broadcast %8 : vector<1x1xf32> to vector<1x128xf32>
    %32 = arith.addf %30, %31 : vector<1x128xf32>
    %c0_17 = arith.constant 0 : index
    %c0_18 = arith.constant 0 : index
    %33 = vector.load %arg4[%c0_17, %c0_18] : memref<1x128xf32, #tpu.memory_space<vmem>>, vector<1x128xf32>
    tpu.vector_store %arg4[%c0_17, %c0_18], %32 {strides = array<i32>} : memref<1x128xf32, #tpu.memory_space<vmem>>, vector<1x128xf32>,
    return
  }
  func.func @transform_0(%arg0: i32) -> (i32, i32) {
    %c0_i32 = arith.constant 0 : i32
    %c0_i32_0 = arith.constant 0 : i32
    return %arg0, %c0_i32 : i32, i32
  }
  func.func @transform_1(%arg0: i32) -> (i32, i32) {
    %c0_i32 = arith.constant 0 : i32
    %c0_i32_0 = arith.constant 0 : i32
    %c0_i32_1 = arith.constant 0 : i32
    return %c0_i32, %c0_i32_0 : i32, i32
  }
  func.func @transform_2(%arg0: i32) -> (i32, i32) {
    %c0_i32 = arith.constant 0 : i32
    %c0_i32_0 = arith.constant 0 : i32
    %c0_i32_1 = arith.constant 0 : i32
    return %c0_i32, %c0_i32_0 : i32, i32
  }
  func.func @transform_3(%arg0: i32) -> (i32, i32) {
    %c0_i32 = arith.constant 0 : i32
    %c0_i32_0 = arith.constant 0 : i32
    return %c0_i32, %arg0 : i32, i32
  }
}

</mosaic_0001>

<bundles_post_ra>
// kernel: tpu_custom_call.1
= control target key start
LH: loop header
LB: loop body
LE: loop exit
PB: predicated region body
PF: predicated region fallthrough
CT: control target
= control target key end

     0   :  { %vm50_vm0 = vcmask 326656   ;;  %v690_v2 = vmov 0   ;;  %s882_s0 = inlined_call_operand.vmem [shape: f32[128,40], index: 0, kind: input, shape index: {}]   ;;  %s883_s1 = inlined_call_operand.vmem [shape: f32[112,40], index: 1, kind: input, shape index: {}]   ;;  %s884_s2 = inlined_call_operand.vmem [shape: f32[32,8], index: 2, kind: input, shape index: {}]   ;;  %s885_s3 = inlined_call_operand.hbm [shape: f32[1,128], index: 3, kind: output, shape index: {}]  }
   0x1   :  { %v30_v0 = vld [vmem:[%s882_s0 + $0x78] sm:$0xff]  ;;  %v29_v1 = vld [vmem:[%s882_s0 + $0x70] sm:$0xff]  ;;  %659 = vset.pattern.permute.xlu0 %v690_v2  ;;  %v28_v3 = vld [vmem:[%s882_s0 + $0x68] sm:$0xff] }
   0x2   :  { %588 = vmatprep.subr.msk.mxu0 %vm50_vm0, %v30_v0  ;;  %v31_v4 = vld [vmem:[%s883_s1] sm:$0xff]  ;;  %v736_v5 = vld [vmem:[%s884_s2 + $0x8] sm:$0xff] }
   0x3   :  { %589 = vmatpush3.xpose.msk.msra.mxu0 %vm50_vm0, %v30_v0  ;;  %620 = vmatprep.mubr.msk.f32.mxu0 %vm50_vm0, %v31_v4 }
   0x4   :  { %590 = vmatprep.subr.msk.mxu0 %vm50_vm0, %v29_v1 }
   0x7   :  { %591 = vmatpush3.xpose.msk.msra.mxu0 %vm50_vm0, %v29_v1 }
   0x8   :  { %8 = vsyncpa [#allocation3], 0  ;;  %592 = vmatprep.subr.msk.mxu0 %vm50_vm0, %v28_v3  ;;  %219 = vperm.xlu0 %659, %v736_v5   ;;  %v27_v6 = vld [vmem:[%s882_s0 + $0x60] sm:$0xff]  ;;  %v26_v8 = vld [vmem:[%s882_s0 + $0x58] sm:$0xff]  ;;  %vm226_vm1 = vcmask 130048   ;;  %v691_v27 = vmov 1  }
   0x9   :  { %v746_v7 = vld [vmem:[%s884_s2] sm:$0xff]  ;;  %v25_v9 = vld [vmem:[%s882_s0 + $0x50] sm:$0xff]  ;;  %v24_v10 = vld [vmem:[%s882_s0 + $0x48] sm:$0xff]  ;;  %660 = vset.pattern.permute.xlu1 %v691_v27  ;;  %vm370_vm2 = vcmask 261120   ;;  %v692_v41 = vmov 2   ;;  %v693_v42 = vmov 3  }
   0xa   :  { %v23_v11 = vld [vmem:[%s882_s0 + $0x40] sm:$0xff]  ;;  %v22_v12 = vld [vmem:[%s882_s0 + $0x38] sm:$0xff]  ;;  %v21_v13 = vld [vmem:[%s882_s0 + $0x30] sm:$0xff]  ;;  %v694_v43 = vmov 4  }
   0xb   :  { %593 = vmatpush3.xpose.msk.msra.mxu0 %vm50_vm0, %v28_v3  ;;  %v20_v14 = vld [vmem:[%s882_s0 + $0x28] sm:$0xff]  ;;  %v19_v15 = vld [vmem:[%s882_s0 + $0x20] sm:$0xff]  ;;  %v18_v16 = vld [vmem:[%s882_s0 + $0x18] sm:$0xff] }
   0xc   :  { %594 = vmatprep.subr.msk.mxu0 %vm50_vm0, %v27_v6  ;;  %214 = vperm.xlu0 %659, %v746_v7   ;;  %v17_v17 = vld [vmem:[%s882_s0 + $0x10] sm:$0xff]  ;;  %v16_v18 = vld [vmem:[%s882_s0 + $0x8] sm:$0xff]  ;;  %v15_v19 = vld [vmem:[%s882_s0] sm:$0xff] }
   0xd   :  { %v32_v20 = vld [vmem:[%s883_s1 + $0x8] sm:$0xff]  ;;  %v33_v21 = vld [vmem:[%s883_s1 + $0x10] sm:$0xff]  ;;  %v34_v22 = vld [vmem:[%s883_s1 + $0x18] sm:$0xff] }
   0xe   :  { %v37_v23 = vld [vmem:[%s883_s1 + $0x30] sm:$0xff]  ;;  %v35_v24 = vld [vmem:[%s883_s1 + $0x20] sm:$0xff]  ;;  %v36_v25 = vld [vmem:[%s883_s1 + $0x28] sm:$0xff] }
   0xf   :  { %595 = vmatpush3.xpose.msk.msra.mxu0 %vm50_vm0, %v27_v6  ;;  %633 = vmatprep.mubr.msk.f32.mxu1 %vm226_vm1, %v37_v23  ;;  %v48_v26 = vld [vmem:[%s884_s2 + $0x18] sm:$0xff]  ;;  %v47_v28 = vld [vmem:[%s884_s2 + $0x10] sm:$0xff]  ;;  %v39_v38 = vld [vmem:[%s883_s1 + $0x40] sm:$0xff] }
  0x10   :  { %596 = vmatprep.subr.msk.mxu0 %vm50_vm0, %v26_v8  ;;  %661 = vset.pattern.permute.xlu0 %v691_v27  ;;  %v38_v37 = vld [vmem:[%s883_s1 + $0x38] sm:$0xff]  ;;  %v40_v39 = vld [vmem:[%s883_s1 + $0x48] sm:$0xff]  ;;  %v41_v40 = vld [vmem:[%s883_s1 + $0x50] sm:$0xff] }
  0x11   :  { %343 = vperm.xlu1 %660, %v48_v26   ;;  %333 = vperm.xlu0 %661, %v736_v5   ;;  %v49_v44 = vld [vmem:[%s884_s2] sm:$0x1] }
  0x12   :  { %v43_v6 = vld [vmem:[%s883_s1 + $0x60] sm:$0xff] }
  0x13   :  { %597 = vmatpush3.xpose.msk.msra.mxu0 %vm50_vm0, %v26_v8 }
  0x14   :  { %598 = vmatprep.subr.msk.mxu0 %vm50_vm0, %v25_v9 }
  0x15   :  { %338 = vperm.xlu1 %660, %v47_v28   ;;  %663 = vset.pattern.permute.xlu0 %v692_v41 }
  0x16   :  { %359 = vperm.xlu0 %663, %v736_v5  }
  0x17   :  { %599 = vmatpush3.xpose.msk.msra.mxu0 %vm50_vm0, %v25_v9 }
  0x18   :  { %600 = vmatprep.subr.msk.mxu0 %vm50_vm0, %v24_v10 }
  0x19   :  { %329 = vperm.xlu1 %660, %v746_v7  }
  0x1a   :  { %664 = vset.pattern.permute.xlu0 %v693_v42 }
  0x1b   :  { %601 = vmatpush3.xpose.msk.msra.mxu0 %vm50_vm0, %v24_v10  ;;  %473 = vperm.xlu0 %664, %v746_v7  }
  0x1c   :  { %602 = vmatprep.subr.msk.mxu0 %vm50_vm0, %v23_v11 }
  0x1d   :  { %662 = vset.pattern.permute.xlu1 %v692_v41 }
  0x1e   :  { %355 = vperm.xlu1 %662, %v746_v7   ;;  %v44_v7 = vld [vmem:[%s883_s1 + $0x68] sm:$0xff] }
  0x1f   :  { %603 = vmatpush3.xpose.msk.msra.mxu0 %vm50_vm0, %v23_v11  ;;  %485 = vperm.xlu0 %664, %v48_v26  }
  0x20   :  { %604 = vmatprep.subr.msk.mxu0 %vm50_vm0, %v22_v12 }
  0x22   :  { %363 = vperm.xlu1 %662, %v47_v28  }
  0x23   :  { %605 = vmatpush3.xpose.msk.msra.mxu0 %vm50_vm0, %v22_v12  ;;  %667 = vset.pattern.permute.xlu0 %v694_v43 }
  0x24   :  { %606 = vmatprep.subr.msk.mxu0 %vm50_vm0, %v21_v13 }
  0x26   :  { %367 = vperm.xlu1 %662, %v48_v26  }
  0x27   :  { %607 = vmatpush3.xpose.msk.msra.mxu0 %vm50_vm0, %v21_v13 }
  0x28   :  { %608 = vmatprep.subr.msk.mxu0 %vm50_vm0, %v20_v14 }
  0x2a   :  { %665 = vset.pattern.permute.xlu1 %v693_v42 }
  0x2b   :  { %609 = vmatpush3.xpose.msk.msra.mxu0 %vm50_vm0, %v20_v14  ;;  %477 = vperm.xlu1 %665, %v736_v5   ;;  %v42_v5 = vld [vmem:[%s883_s1 + $0x58] sm:$0xff]  ;;  %s695_s1 = smov [#allocation2]  }
  0x2c   :  { %610 = vmatprep.subr.msk.mxu0 %vm50_vm0, %v19_v15  ;;  %s514_s26 = sshll.u32 %s695_s1, 4  ;;  %s515_s26 = int_to_ptr.vmem [resolvable:$true] %s514_s26 }
  0x2d   :  { %s668_s27 = scalar_lea.vmem %s515_s26, 16  ;;  %s672_s0 = scalar_lea.vmem %s515_s26, 32 }
  0x2e   :  { %p669_p0 = scmp.ne.s32.totalorder %s515_s26, %s668_s27  ;;  %p673_p1 = scmp.lt.s32.totalorder %s515_s26, %s515_s26 }
  0x2f   :  { %611 = vmatpush3.xpose.msk.msra.mxu0 %vm50_vm0, %v19_v15  ;;  %481 = vperm.xlu1 %665, %v47_v28   ;;  %p674_p2 = scmp.lt.s32.totalorder %s672_s0, %s668_s27 }
  0x30   :  { %612 = vmatprep.subr.msk.mxu0 %vm50_vm0, %v18_v16 }
  0x31   :  { %p675_p3 = por %p674_p2, %p673_p1 }
  0x33   :  { %613 = vmatpush3.xpose.msk.msra.mxu0 %vm50_vm0, %v18_v16  ;;  %666 = vset.pattern.permute.xlu1 %v694_v43  ;;  %p676_p4 = pnand %p675_p3, %p669_p0 }
  0x34   :  { %614 = vmatprep.subr.msk.mxu0 %vm50_vm0, %v17_v17  ;;  %503 = vperm.xlu1 %666, %v49_v44  }
  0x37   :  { %615 = vmatpush3.xpose.msk.msra.mxu0 %vm50_vm0, %v17_v17 }
  0x38   :  { %616 = vmatprep.subr.msk.mxu0 %vm50_vm0, %v16_v18 }
  0x3b   :  { %617 = vmatpush3.xpose.msk.msra.mxu0 %vm50_vm0, %v16_v18 }
  0x3c   :  { %618 = vmatprep.subr.msk.mxu0 %vm50_vm0, %v15_v19 }
  0x3f   :  { %619 = vmatpush3.xpose.msk.msra.mxu0 %vm50_vm0, %v15_v19 }
  0x42   :  { %621 = vmatmul.mubr.msk.f32.vlgmr.msra.gmra.mxu0 %vm50_vm0, %v32_v20 }
  0x43   :  { %623 = vmatprep.mubr.msk.f32.mxu0 %vm50_vm0, %v33_v21 }
  0x46   :  { %624 = vmatmul.mubr.msk.f32.gmra.mxu0 %vm50_vm0, %v34_v22 }
  0x47   :  { %626 = vmatprep.mubr.msk.f32.mxu0 %vm50_vm0, %v35_v24 }
  0x4a   :  { %627 = vmatmul.mubr.msk.f32.gmra.mxu0 %vm50_vm0, %v36_v25 }
  0x83   :  { %v220_v29 = vpop.permute.xlu0 %219 }
  0x87   :  { %v215_v32 = vpop.permute.xlu0 %214 }
  0x8c   :  { %v344_v46 = vpop.permute.xlu1 %343  ;;  %v334_v54 = vpop.permute.xlu0 %333 }
  0x90   :  { %v339_v49 = vpop.permute.xlu1 %338 }
  0x91   :  { %v360_v10 = vpop.permute.xlu0 %359 }
  0x94   :  { %v330_v61 = vpop.permute.xlu1 %329 }
  0x96   :  { %v474_v17 = vpop.permute.xlu0 %473 }
  0x99   :  { %v356_v8 = vpop.permute.xlu1 %355 }
  0x9d   :  { %v364_v9 = vpop.permute.xlu1 %363 }
  0xa1   :  { %v368_v11 = vpop.permute.xlu1 %367 }
  0xa6   :  { %v478_v16 = vpop.permute.xlu1 %477 }
  0xaa   :  { %v482_v28 = vpop.permute.xlu1 %481 }
 0x102   :  { %v622_v30 = vpop.f32.mrf.mxu0 }
 0x103   :  { %v223_v31 = vadd.f32 %v622_v30, %v220_v29  ;;  %v486_v29 = vpop.permute.xlu0 %485 }
 0x104   :  { %v183_v33 = vpop.f32.mrf.mxu0 }
 0x105   :  { %v225_v34 = vmax.f32 %v223_v31, 0.0  ;;  %v222_v35 = vadd.f32 %v215_v32, %v183_v33 }
 0x106   :  { %v625_v45 = vpop.f32.mrf.mxu0 }
 0x107   :  { %v224_v36 = vmax.f32 %v222_v35, 0.0  ;;  %629 = vmatprep.subr.mxu1 %v225_v34 }
 0x108   :  { %630 = vmatpush3.msra.mxu1 %v225_v34  ;;  %v193_v47 = vpop.f32.mrf.mxu0 }
 0x109   :  { %631 = vmatprep.subr.mxu1 %v224_v36 }
 0x10a   :  { %632 = vmatpush3.msra.mxu1 %v224_v36  ;;  %v628_v50 = vpop.f32.mrf.mxu0 }
 0x10b   :  { %634 = vmatmul.mubr.msk.f32.vlgmr.msra.gmra.mxu1 %vm226_vm1, %v38_v37 }
 0x10c   :  { %636 = vmatprep.mubr.msk.f32.mxu1 %vm226_vm1, %v39_v38  ;;  %v203_v56 = vpop.f32.mrf.mxu0 }
 0x10f   :  { %637 = vmatmul.mubr.msk.f32.gmra.mxu1 %vm226_vm1, %v40_v39 }
 0x110   :  { %647 = vmatprep.mubr.msk.f32.mxu1 %vm370_vm2, %v41_v40  ;;  %v504_v40 = vpop.permute.xlu1 %503 }
 0x1cb   :  { %v635_v48 = vpop.f32.mrf.mxu1 }
 0x1cc   :  { %v325_v53 = vadd.f32 %v635_v48, %v625_v45 }
 0x1cd   :  { %v305_v51 = vpop.f32.mrf.mxu1 }
 0x1ce   :  { %v324_v58 = vadd.f32 %v305_v51, %v193_v47  ;;  %v347_v62 = vadd.f32 %v334_v54, %v325_v53 }
 0x1cf   :  { %v638_v52 = vpop.f32.mrf.mxu1 }
 0x1d0   :  { %v327_v55 = vadd.f32 %v638_v52, %v628_v50  ;;  %v346_v1 = vadd.f32 %v330_v61, %v324_v58  ;;  %v351_v3 = vmax.f32 %v347_v62, 0.0 }
 0x1d1   :  { %v315_v57 = vpop.f32.mrf.mxu1 }
 0x1d2   :  { %v349_v59 = vadd.f32 %v344_v46, %v327_v55  ;;  %v326_v60 = vadd.f32 %v315_v57, %v203_v56  ;;  %v350_v4 = vmax.f32 %v346_v1, 0.0 }
 0x1d4   :  { %v353_v63 = vmax.f32 %v349_v59, 0.0  ;;  %v348_v0 = vadd.f32 %v339_v49, %v326_v60 }
 0x1d6   :  { %v352_v2 = vmax.f32 %v348_v0, 0.0  ;;  %639 = vmatprep.subr.mxu1 %v353_v63 }
 0x1d7   :  { %640 = vmatpush3.msra.mxu1 %v353_v63 }
 0x1d8   :  { %641 = vmatprep.subr.mxu1 %v352_v2 }
 0x1d9   :  { %642 = vmatpush3.msra.mxu1 %v352_v2 }
 0x1da   :  { %643 = vmatprep.subr.mxu1 %v351_v3 }
 0x1db   :  { %644 = vmatpush3.msra.mxu1 %v351_v3 }
 0x1dc   :  { %645 = vmatprep.subr.mxu1 %v350_v4 }
 0x1dd   :  { %646 = vmatpush3.msra.mxu1 %v350_v4 }
 0x1de   :  { %648 = vmatmul.mubr.msk.f32.vlgmr.msra.gmra.mxu1 %vm370_vm2, %v42_v5 }
 0x1df   :  { %650 = vmatprep.mubr.msk.f32.mxu1 %vm370_vm2, %v43_v6 }
 0x1e2   :  { %651 = vmatmul.mubr.msk.f32.gmra.mxu1 %vm370_vm2, %v44_v7 }
 0x29e   :  { %v649_v12 = vpop.f32.mrf.mxu1 }
 0x29f   :  { %v455_v13 = vadd.f32 %v649_v12, %v360_v10 }
 0x2a0   :  { %v449_v14 = vpop.f32.mrf.mxu1 }
 0x2a1   :  { %v450_v15 = vadd.f32 %v449_v14, %v356_v8  ;;  %v469_v19 = vmax.f32 %v455_v13, 0.0 }
 0x2a2   :  { %v652_v18 = vpop.f32.mrf.mxu1 }
 0x2a3   :  { %v468_v20 = vmax.f32 %v450_v15, 0.0  ;;  %v465_v21 = vadd.f32 %v652_v18, %v368_v11  ;;  %v489_v25 = vmul.f32 %v478_v16, %v469_v19 }
 0x2a4   :  { %v459_v22 = vpop.f32.mrf.mxu1 }
 0x2a5   :  { %v488_v23 = vmul.f32 %v474_v17, %v468_v20  ;;  %v460_v24 = vadd.f32 %v459_v22, %v364_v9  ;;  %v471_v26 = vmax.f32 %v465_v21, 0.0 }
 0x2a7   :  { %v470_v27 = vmax.f32 %v460_v24, 0.0  ;;  %v492_v30 = vadd.f32 %v489_v25, %v488_v23  ;;  %v491_v33 = vmul.f32 %v486_v29, %v471_v26 }
 0x2a9   :  { %v490_v31 = vmul.f32 %v482_v28, %v470_v27 }
 0x2ab   :  { %v493_v32 = vadd.f32 %v492_v30, %v490_v31 }
 0x2ad   :  { %v494_v34 = vadd.f32 %v493_v32, %v491_v33 }
 0x2af   :  { %v495_v35 = vrot.slane %v494_v34, 4 }
 0x2b1   :  { %v496_v36 = vadd.f32 %v495_v35, %v494_v34 }
 0x2b3   :  { %v497_v37 = vrot.slane %v496_v36, 2 }
 0x2b5   :  { %v498_v38 = vadd.f32 %v497_v37, %v496_v36 }
 0x2b7   :  { %v499_v39 = vrot.slane %v498_v38, 1 }
 0x2b9   :  { %v500_v41 = vadd.f32 %v499_v39, %v498_v38 }
 0x2bb   :  { %v506_v42 = vadd.f32 %v504_v40, %v500_v41 }
 0x2bd   :  { %507 = vst [vmem:[#allocation2] sm:$0x1] %v506_v42 }
 0x2be   :  { %679 = shalt.err (!%p676_p4)
}
 0x2bf   :  { %517 = dma.vmem_to_hbm [thread:$0]  %s515_s26, 16, %s885_s3, [#allocation3]  }
 0x2c0   :  { %688 = dma.done.wait [#allocation3], 16  }
 0x2c1   :  { %689 = vsyncadd [#allocation3], 4294967280 }
 0x2c2   :  { %521 = vsyncpa [#allocation3], 1 }

</bundles_post_ra>
